<compile_context>
chip_gen: v6e
topology: v6e:2x2x1
jax: 0.10.0
libtpu: 0.0.40
codegen_flags: <defaults>
</compile_context>

<pallas_src>
from functools import partial

import jax
import jax.numpy as jnp
from jax.experimental import pallas as pl
from jax.experimental.pallas import tpu as pltpu

DROPOUT_P = 0.2
_KEEP_SCALE = 1.0 / (1.0 - DROPOUT_P)
_DROP_THRESHOLD = int(DROPOUT_P * (1 << 32))  # drop iff bits < threshold


def ffn_kernel(*refs, train):
    if train:
        x_ref, w1_ref, b1_ref, w2_ref, b2_ref, bits_ref, o_ref = refs
    else:
        x_ref, w1_ref, b1_ref, w2_ref, b2_ref, o_ref = refs

    # linear1 + ReLU: bf16 MXU matmul, f32 accumulation, f32 bias.
    x = x_ref[...].astype(jnp.bfloat16)
    h = jnp.dot(x, w1_ref[...], preferred_element_type=jnp.float32) + b1_ref[...]
    h = jnp.maximum(h, 0.0)

    # linear2
    y = jnp.dot(h.astype(jnp.bfloat16), w2_ref[...],
                preferred_element_type=jnp.float32) + b2_ref[...]

    if train:
        # Dropout(p): keep with prob 1-p and scale by 1/(1-p).  Single integer
        # threshold compare on raw uint32 random bits (no shifts / converts).
        keep = bits_ref[...] >= jnp.uint32(_DROP_THRESHOLD)
        y = jnp.where(keep, y * _KEEP_SCALE, 0.0)

    o_ref[...] = y.astype(o_ref.dtype)


def feed_forward(x, w1, b1, w2, b2, *, key=None, train=True, tm=None):
    """x: (B, L, N) -> (B, L, N). w1: (N, 4N), b1: (4N,), w2: (4N, N), b2: (N,)."""
    B, L, N = x.shape
    H = w1.shape[1]
    M = B * L
    x2 = x.reshape(M, N)

    if tm is None:
        for cand in (256, 128, 64, 32, 16, 8):
            if M % cand == 0:
                tm = cand
                break
        else:
            tm = M  # small/odd M: single full-row block
    assert M % tm == 0, "token count must divide evenly into row tiles"

    # Cast weights to bf16 once (MXU input dtype); keep biases f32 for the add.
    w1b = w1.astype(jnp.bfloat16)
    w2b = w2.astype(jnp.bfloat16)
    b1r = b1.reshape(1, H).astype(jnp.float32)
    b2r = b2.reshape(1, N).astype(jnp.float32)

    single = pl.Buffered(1)  # grid-invariant operands: no double-buffer VMEM tax
    in_specs = [
        pl.BlockSpec((tm, N), lambda i: (i, 0)),                          # x rows
        pl.BlockSpec((N, H), lambda i: (0, 0), pipeline_mode=single),     # w1
        pl.BlockSpec((1, H), lambda i: (0, 0), pipeline_mode=single),     # b1
        pl.BlockSpec((H, N), lambda i: (0, 0), pipeline_mode=single),     # w2
        pl.BlockSpec((1, N), lambda i: (0, 0), pipeline_mode=single),     # b2
    ]
    args = [x2, w1b, b1r, w2b, b2r]

    if train:
        if key is None:
            key = jax.random.PRNGKey(0)
        # Dropout random bits generated host-side (pltpu stateful PRNG has no
        # interpret-mode lowering); consumed in-kernel via threshold compare.
        bits = jax.random.bits(key, (M, N), dtype=jnp.uint32)
        in_specs.append(pl.BlockSpec((tm, N), lambda i: (i, 0)))          # bits rows
        args.append(bits)

    # Explicit VMEM budget (weights single-buffered, row tiles double-buffered,
    # hidden intermediate), with 2x headroom, clamped to a sane range.
    weight_bytes = 2 * (N * H + H * N) + 4 * (H + N)
    tile_bytes = 2 * tm * N * 4 * (3 if train else 2)      # x, out (+ bits), 2 buffers
    inter_bytes = tm * H * 4 + tm * H * 2 + tm * N * 4     # h f32, h bf16, y f32
    vmem_limit = int(min(max(2 * (weight_bytes + tile_bytes + inter_bytes),
                             32 * 1024 * 1024), 128 * 1024 * 1024))

    out = pl.pallas_call(
        partial(ffn_kernel, train=train),
        out_shape=jax.ShapeDtypeStruct((M, N), x.dtype),
        grid_spec=pltpu.PrefetchScalarGridSpec(
            num_scalar_prefetch=0,
            grid=(M // tm,),
            in_specs=in_specs,
            out_specs=pl.BlockSpec((tm, N), lambda i: (i, 0)),
        ),
        compiler_params=pltpu.CompilerParams(
            dimension_semantics=("parallel",),  # independent row tiles -> megacore OK
            vmem_limit_bytes=vmem_limit,
        ),
    )(*args)

    return out.reshape(B, L, N)


if __name__ == "__main__":
    # Small shapes implied by the module: x is (B, L, model_size).
    B, L, N = 2, 8, 32
    H = 4 * N

    key = jax.random.PRNGKey(0)
    k1, k2, k3, k4, kx, kd = jax.random.split(key, 6)

    # Deterministic init mimicking nn.Linear (uniform +/- 1/sqrt(fan_in)).
    bound1 = 1.0 / (N ** 0.5)
    w1 = jax.random.uniform(k1, (N, H), jnp.float32, -bound1, bound1)
    b1 = jax.random.uniform(k2, (H,), jnp.float32, -bound1, bound1)
    bound2 = 1.0 / (H ** 0.5)
    w2 = jax.random.uniform(k3, (H, N), jnp.float32, -bound2, bound2)
    b2 = jax.random.uniform(k4, (N,), jnp.float32, -bound2, bound2)

    x = jax.random.normal(kx, (B, L, N), jnp.float32)

    # Training-mode run (dropout active).
    y_train = feed_forward(x, w1, b1, w2, b2, key=kd, train=True)
    jax.block_until_ready(y_train)
    assert y_train.shape == (B, L, N)
    assert y_train.dtype == x.dtype

    # Eval-mode run vs. a pure-JAX reference using the same bf16-in/f32-acc contraction.
    y_eval = feed_forward(x, w1, b1, w2, b2, train=False)
    x2 = x.reshape(-1, N)
    h_ref = jnp.maximum(
        jnp.dot(x2.astype(jnp.bfloat16), w1.astype(jnp.bfloat16),
                preferred_element_type=jnp.float32) + b1, 0.0)
    ref = jnp.dot(h_ref.astype(jnp.bfloat16), w2.astype(jnp.bfloat16),
                  preferred_element_type=jnp.float32) + b2
    assert jnp.allclose(y_eval.reshape(-1, N), ref, atol=1e-3, rtol=1e-3)

    # Every training-mode element is either dropped (0) or ref / (1 - p).
    yt = y_train.reshape(-1, N)
    scaled = ref * _KEEP_SCALE
    ok = jnp.isclose(yt, 0.0, atol=1e-6) | jnp.isclose(yt, scaled, atol=1e-3, rtol=1e-3)
    assert bool(jnp.all(ok))

    print("KERNEL_OK")
</pallas_src>

<mosaic_0001>
module attributes {stable_mosaic.version = 11 : i64} {
  func.func @ffn_kernel(%arg0: i32, %arg1: memref<16x32xf32, #tpu.memory_space<vmem>>, %arg2: memref<32x128xbf16, #tpu.memory_space<vmem>>, %arg3: memref<1x128xf32, #tpu.memory_space<vmem>>, %arg4: memref<128x32xbf16, #tpu.memory_space<vmem>>, %arg5: memref<1x32xf32, #tpu.memory_space<vmem>>, %arg6: memref<16x32xi32, #tpu.memory_space<vmem>>, %arg7: memref<16x32xf32, #tpu.memory_space<vmem>>) attributes {dimension_semantics = [#tpu.dimension_semantics<parallel>], iteration_bounds = array<i64: 1>, scalar_prefetch = 0 : i64, scratch_operands = 0 : i64, tpu.core_type = #tpu.core_type<tc>, window_params = [{transform_indices = @transform_0, window_bounds = array<i64: 16, 32>}, {pipeline_mode = #tpu.pipeline_mode<synchronous>, transform_indices = @transform_1, window_bounds = array<i64: 32, 128>}, {pipeline_mode = #tpu.pipeline_mode<synchronous>, transform_indices = @transform_2, window_bounds = array<i64: 1, 128>}, {pipeline_mode = #tpu.pipeline_mode<synchronous>, transform_indices = @transform_3, window_bounds = array<i64: 128, 32>}, {pipeline_mode = #tpu.pipeline_mode<synchronous>, transform_indices = @transform_4, window_bounds = array<i64: 1, 32>}, {transform_indices = @transform_5, window_bounds = array<i64: 16, 32>}, {transform_indices = @transform_6, window_bounds = array<i64: 16, 32>}]} {
    %c0 = arith.constant 0 : index
    %c0_0 = arith.constant 0 : index
    %0 = vector.load %arg1[%c0, %c0_0] : memref<16x32xf32, #tpu.memory_space<vmem>>, vector<16x32xf32>
    %1 = arith.truncf %0 : vector<16x32xf32> to vector<16x32xbf16>
    %c0_1 = arith.constant 0 : index
    %c0_2 = arith.constant 0 : index
    %2 = vector.load %arg2[%c0_1, %c0_2] : memref<32x128xbf16, #tpu.memory_space<vmem>>, vector<32x128xbf16>
    %cst = arith.constant dense<0.000000e+00> : vector<16x128xf32>
    %3 = tpu.matmul %1, %2, %cst {dimension_numbers = #tpu.dot_dimension_numbers<[1], [0], [0], [1], [0, 0, 1, 1], [], []>} : vector<16x32xbf16>, vector<32x128xbf16>, vector<16x128xf32> -> vector<16x128xf32>
    %c0_3 = arith.constant 0 : index
    %c0_4 = arith.constant 0 : index
    %4 = vector.load %arg3[%c0_3, %c0_4] : memref<1x128xf32, #tpu.memory_space<vmem>>, vector<1x128xf32>
    %5 = vector.broadcast %4 : vector<1x128xf32> to vector<16x128xf32>
    %6 = arith.addf %3, %5 : vector<16x128xf32>
    %cst_5 = arith.constant 0.000000e+00 : f32
    %7 = vector.broadcast %cst_5 : f32 to vector<16x128xf32>
    %8 = arith.maximumf %6, %7 : vector<16x128xf32>
    %9 = arith.truncf %8 : vector<16x128xf32> to vector<16x128xbf16>
    %c0_6 = arith.constant 0 : index
    %c0_7 = arith.constant 0 : index
    %10 = vector.load %arg4[%c0_6, %c0_7] : memref<128x32xbf16, #tpu.memory_space<vmem>>, vector<128x32xbf16>
    %cst_8 = arith.constant dense<0.000000e+00> : vector<16x32xf32>
    %11 = tpu.matmul %9, %10, %cst_8 {dimension_numbers = #tpu.dot_dimension_numbers<[1], [0], [0], [1], [0, 0, 1, 1], [], []>} : vector<16x128xbf16>, vector<128x32xbf16>, vector<16x32xf32> -> vector<16x32xf32>
    %c0_9 = arith.constant 0 : index
    %c0_10 = arith.constant 0 : index
    %12 = vector.load %arg5[%c0_9, %c0_10] : memref<1x32xf32, #tpu.memory_space<vmem>>, vector<1x32xf32>
    %13 = vector.broadcast %12 : vector<1x32xf32> to vector<16x32xf32>
    %14 = arith.addf %11, %13 : vector<16x32xf32>
    %c0_11 = arith.constant 0 : index
    %c0_12 = arith.constant 0 : index
    %15 = vector.load %arg6[%c0_11, %c0_12] : memref<16x32xi32, #tpu.memory_space<vmem>>, vector<16x32xi32>
    %c858993459_i32 = arith.constant 858993459 : i32
    %16 = vector.broadcast %c858993459_i32 : i32 to vector<16x32xi32>
    %17 = arith.cmpi uge, %15, %16 : vector<16x32xi32>
    %cst_13 = arith.constant 1.250000e+00 : f32
    %18 = vector.broadcast %cst_13 : f32 to vector<16x32xf32>
    %19 = arith.mulf %14, %18 : vector<16x32xf32>
    %cst_14 = arith.constant 0.000000e+00 : f32
    %20 = vector.broadcast %cst_14 : f32 to vector<16x32xf32>
    %21 = arith.select %17, %19, %20 : vector<16x32xi1>, vector<16x32xf32>
    %c0_15 = arith.constant 0 : index
    %c0_16 = arith.constant 0 : index
    %22 = vector.load %arg7[%c0_15, %c0_16] : memref<16x32xf32, #tpu.memory_space<vmem>>, vector<16x32xf32>
    tpu.vector_store %arg7[%c0_15, %c0_16], %21 {strides = array<i32>} : memref<16x32xf32, #tpu.memory_space<vmem>>, vector<16x32xf32>,
    return
  }
  func.func @transform_0(%arg0: i32) -> (i32, i32) {
    %c0_i32 = arith.constant 0 : i32
    %c0_i32_0 = arith.constant 0 : i32
    return %arg0, %c0_i32 : i32, i32
  }
  func.func @transform_1(%arg0: i32) -> (i32, i32) {
    %c0_i32 = arith.constant 0 : i32
    %c0_i32_0 = arith.constant 0 : i32
    %c0_i32_1 = arith.constant 0 : i32
    return %c0_i32, %c0_i32_0 : i32, i32
  }
  func.func @transform_2(%arg0: i32) -> (i32, i32) {
    %c0_i32 = arith.constant 0 : i32
    %c0_i32_0 = arith.constant 0 : i32
    %c0_i32_1 = arith.constant 0 : i32
    return %c0_i32, %c0_i32_0 : i32, i32
  }
  func.func @transform_3(%arg0: i32) -> (i32, i32) {
    %c0_i32 = arith.constant 0 : i32
    %c0_i32_0 = arith.constant 0 : i32
    %c0_i32_1 = arith.constant 0 : i32
    return %c0_i32, %c0_i32_0 : i32, i32
  }
  func.func @transform_4(%arg0: i32) -> (i32, i32) {
    %c0_i32 = arith.constant 0 : i32
    %c0_i32_0 = arith.constant 0 : i32
    %c0_i32_1 = arith.constant 0 : i32
    return %c0_i32, %c0_i32_0 : i32, i32
  }
  func.func @transform_5(%arg0: i32) -> (i32, i32) {
    %c0_i32 = arith.constant 0 : i32
    %c0_i32_0 = arith.constant 0 : i32
    return %arg0, %c0_i32 : i32, i32
  }
  func.func @transform_6(%arg0: i32) -> (i32, i32) {
    %c0_i32 = arith.constant 0 : i32
    %c0_i32_0 = arith.constant 0 : i32
    return %arg0, %c0_i32 : i32, i32
  }
}

</mosaic_0001>

<bundles_post_ra>
// kernel: tpu_custom_call.1
= control target key start
LH: loop header
LB: loop body
LE: loop exit
PB: predicated region body
PF: predicated region fallthrough
CT: control target
= control target key end

     0   :  { %v327_v1 = vmov 0.0   ;;  %vm328_vm0 = vmmov 0   ;;  %vm51_vm1 = vcmask 261120   ;;  %s421_s0 = inlined_call_operand.vmem [shape: f32[16,32], index: 0, kind: input, shape index: {}]   ;;  %s422_s1 = inlined_call_operand.vmem [shape: bf16[32,128], index: 1, kind: input, shape index: {}]   ;;  %s423_s2 = inlined_call_operand.vmem [shape: f32[1,128], index: 2, kind: input, shape index: {}]   ;;  %s424_s3 = inlined_call_operand.vmem [shape: bf16[128,32], index: 3, kind: input, shape index: {}]   ;;  %s425_s4 = inlined_call_operand.vmem [shape: f32[1,32], index: 4, kind: input, shape index: {}]   ;;  %s426_s5 = inlined_call_operand.vmem [shape: u32[16,32], index: 5, kind: input, shape index: {}]   ;;  %s427_s6 = inlined_call_operand.hbm [shape: f32[16,32], index: 6, kind: output, shape index: {}]  }
   0x1   :  { %v295_v0 = vld [vmem:[%s422_s1 + $0x8] sm:$0xff]   ;;  %262 = vmatprep.subr.bf16.mxu0 %v327_v1  ;;  %v296_v2 = vld [vmem:[%s422_s1] sm:$0xff]   ;;  %270 = vmatprep.subr.bf16.mxu1 %v327_v1  ;;  %v297_v5 = vld [vmem:[%s424_s3 + $0x38] sm:$0xff]  }
   0x2   :  { %263 = vmatpush3.bf16.msra.mxu0 %v295_v0  ;;  %266 = vmatprep.mubr.msk.bf16.mxu0 %vm328_vm0, %v327_v1  ;;  %v25_v3 = vld [vmem:[%s421_s0] sm:$0xff]  ;;  %v26_v4 = vld [vmem:[%s421_s0 + $0x8] sm:$0xff]  ;;  %v298_v7 = vld [vmem:[%s424_s3 + $0x30] sm:$0xff]  }
   0x3   :  { %264 = vmatprep.subr.bf16.mxu0 %v327_v1  ;;  %286 = vmatprep.mubr.msk.bf16.mxu1 %vm328_vm0, %v327_v1  ;;  %v27_v6 = vpack.c.bf16 %v26_v4, %v25_v3  ;;  %v299_v8 = vld [vmem:[%s424_s3 + $0x28] sm:$0xff]  }
   0x4   :  { %271 = vmatpush3.bf16.msra.mxu1 %v297_v5 }
   0x5   :  { %272 = vmatprep.subr.bf16.mxu1 %v327_v1 }
   0x6   :  { %265 = vmatpush3.bf16.msra.mxu0 %v296_v2 }
   0x8   :  { %273 = vmatpush3.bf16.msra.mxu1 %v298_v7 }
   0x9   :  { %267 = vmatmul.mubr.msk.bf16.vlgmr.msra.gmra.mxu0 %vm51_vm1, %v27_v6  ;;  %274 = vmatprep.subr.bf16.mxu1 %v327_v1 }
   0xa   :  { %11 = vsyncpa [#allocation3], 0  ;;  %v300_v9 = vld [vmem:[%s424_s3 + $0x20] sm:$0xff]   ;;  %v301_v10 = vld [vmem:[%s424_s3 + $0x18] sm:$0xff]   ;;  %s329_s25 = smov [#allocation2]  }
   0xb   :  { %v302_v11 = vld [vmem:[%s424_s3 + $0x10] sm:$0xff]   ;;  %v303_v12 = vld [vmem:[%s424_s3 + $0x8] sm:$0xff]   ;;  %v304_v13 = vld [vmem:[%s424_s3] sm:$0xff]   ;;  %s226_s26 = sshll.u32 %s329_s25, 4  ;;  %s227_s26 = int_to_ptr.vmem [resolvable:$true] %s226_s26 }
   0xc   :  { %275 = vmatpush3.bf16.msra.mxu1 %v299_v8  ;;  %v237_v14 = vld [vmem:[%s423_s2] ss:$0 sm:$0xff]  ;;  %v212_v30 = vld [vmem:[%s426_s5 + $0x8] sm:$0xff]  ;;  %p310_p1 = scmp.lt.s32.totalorder %s227_s26, %s227_s26 }
   0xd   :  { %276 = vmatprep.subr.bf16.mxu1 %v327_v1  ;;  %v241_v24 = vld [vmem:[%s425_s4] ss:$0 sm:$0xff]  ;;  %vm214_vm3 = vcmp.ge.u32.totalorder %v212_v30, 858993459  ;;  %s305_s4 = scalar_lea.vmem %s227_s26, 256 }
   0xe   :  { %v211_v25 = vld [vmem:[%s426_s5] sm:$0xff]  ;;  %p306_p0 = scmp.ne.s32.totalorder %s227_s26, %s305_s4  ;;  %p311_p2 = scmp.lt.s32.totalorder %s305_s4, %s305_s4 }
   0xf   :  { %vm213_vm2 = vcmp.ge.u32.totalorder %v211_v25, 858993459 }
  0x10   :  { %277 = vmatpush3.bf16.msra.mxu1 %v300_v9  ;;  %p312_p3 = por %p311_p2, %p310_p1 }
  0x11   :  { %278 = vmatprep.subr.bf16.mxu1 %v327_v1 }
  0x12   :  { %p313_p4 = pnand %p312_p3, %p306_p0 }
  0x14   :  { %279 = vmatpush3.bf16.msra.mxu1 %v301_v10 }
  0x15   :  { %280 = vmatprep.subr.bf16.mxu1 %v327_v1 }
  0x18   :  { %281 = vmatpush3.bf16.msra.mxu1 %v302_v11 }
  0x19   :  { %282 = vmatprep.subr.bf16.mxu1 %v327_v1 }
  0x1c   :  { %283 = vmatpush3.bf16.msra.mxu1 %v303_v12 }
  0x1d   :  { %284 = vmatprep.subr.bf16.mxu1 %v327_v1 }
  0x20   :  { %285 = vmatpush3.bf16.msra.mxu1 %v304_v13 }
  0xc9   :  { %v89_v15 = vpop.f32.mrf.mxu0 }
  0xca   :  { %v90_v17 = vadd.f32 %v237_v14, %v89_v15 }
  0xcb   :  { %v268_v16 = vpop.f32.mrf.mxu0 }
  0xcc   :  { %v96_v21 = vmax.f32 %v90_v17, 0.0 }
  0xcd   :  { %v92_v18 = vpop.f32.mrf.mxu0 }
  0xce   :  { %v93_v19 = vadd.f32 %v237_v14, %v92_v18 }
  0xcf   :  { %v269_v20 = vpop.f32.mrf.mxu0 }
  0xd0   :  { %v97_v22 = vmax.f32 %v93_v19, 0.0 }
  0xd2   :  { %v98_v23 = vpack.c.bf16 %v97_v22, %v96_v21 }
  0xd4   :  { %287 = vmatmul.mubr.bf16.vlgmr.msra.gmra.mxu1 %v98_v23 }
 0x194   :  { %v204_v26 = vpop.f32.mrf.mxu1 }
 0x195   :  { %v205_v27 = vadd.f32 %v241_v24, %v204_v26 }
 0x196   :  { %v288_v28 = vpop.f32.mrf.mxu1 }
 0x197   :  { %v215_v29 = vmul.f32 1.25, %v205_v27 }
 0x198   :  { %v207_v31 = vpop.f32.mrf.mxu1 }
 0x199   :  { %v217_v32 = vsel %vm213_vm2, %v215_v29, 0.0  ;;  %v208_v33 = vadd.f32 %v241_v24, %v207_v31 }
 0x19a   :  { %219 = vst.msk [vmem:[#allocation2] sm:$0xff] %vm51_vm1, %v217_v32  ;;  %v289_v34 = vpop.f32.mrf.mxu1 }
 0x19b   :  { %v216_v35 = vmul.f32 1.25, %v208_v33 }
 0x19d   :  { %v218_v36 = vsel %vm214_vm3, %v216_v35, 0.0 }
 0x19e   :  { %220 = vst.msk [vmem:[#allocation2 + $0x8] sm:$0xff] %vm51_vm1, %v218_v36 }
 0x19f   :  { %316 = shalt.err (!%p313_p4)
}
 0x1a0   :  { %s330_s5 = smov 128   ;;  %s331_s27 = smov 8  }
 0x1a1   :  { %232 = dma.vmem_to_hbm [thread:$0]  %s227_s26, 256, %s427_s6, [#allocation3], %s330_s5, %s330_s5, %s331_s27  }
 0x1a2   :  { %325 = dma.done.wait [#allocation3], 256  }
 0x1a3   :  { %326 = vsyncadd [#allocation3], 4294967040 }
 0x1a4   :  { %236 = vsyncpa [#allocation3], 1 }

</bundles_post_ra>
